<compile_context>
chip_gen: v5e
topology: v5e:2x2
jax: 0.10.0
libtpu: 0.0.40
codegen_flags: <defaults>
</compile_context>

<pallas_src>
import jax
import jax.numpy as jnp
from jax.experimental import pallas as pl
from jax.experimental.pallas import tpu as pltpu

LOG_STD_MIN = -20.0
LOG_STD_MAX = 2.0


def _round_up(n, m):
    return (n + m - 1) // m * m


def _policy_kernel(x_ref, w1_ref, b1_ref, w2_ref, b2_ref, wh_ref, bh_ref,
                   lo_ref, hi_ref, out_ref):
    # Entire (tiny) MLP fits in VMEM; matmuls on the MXU with f32 accumulation,
    # relu / bias-add / clamp on the VPU in f32.
    cdt = w1_ref.dtype                      # compute dtype (bf16 or f32)
    x = x_ref[...]

    h = jnp.dot(x, w1_ref[...], preferred_element_type=jnp.float32) + b1_ref[...]
    h = jnp.maximum(h, 0.0).astype(cdt)     # relu; re-cast so next matmul is bf16

    h = jnp.dot(h, w2_ref[...], preferred_element_type=jnp.float32) + b2_ref[...]
    h = jnp.maximum(h, 0.0).astype(cdt)     # relu; re-cast so head matmul is bf16

    # Fused head: columns [0, A) = mean, [A, 2A) = log_std, rest = padding.
    head = jnp.dot(h, wh_ref[...], preferred_element_type=jnp.float32) + bh_ref[...]

    # Per-column clamp via resident lo/hi rows (±FLT_MAX for mean/pad columns,
    # [-20, 2] for log_std columns): 2 VPU passes, no iota/mask vregs.
    out_ref[...] = jnp.minimum(jnp.maximum(head, lo_ref[...]),
                               hi_ref[...]).astype(out_ref.dtype)


def pack_params(params, dtype=jnp.bfloat16):
    """Pad hidden widths to 128 lanes, fuse mean/log_std heads, build clamp rows.

    Weights are stored in `dtype` (default bf16 for the MXU); biases and the
    lo/hi clamp rows stay f32 (added/applied to the f32 dot accumulator).
    """
    in_dim, h1 = params["w1"].shape
    _, h2 = params["w2"].shape
    _, a_dim = params["wm"].shape

    H1 = _round_up(h1, 128)
    H2 = _round_up(h2, 128)
    HEAD = _round_up(2 * a_dim, 128)

    w1p = jnp.zeros((in_dim, H1), dtype).at[:, :h1].set(params["w1"].astype(dtype))
    b1p = jnp.zeros((1, H1), jnp.float32).at[:, :h1].set(params["b1"])

    w2p = jnp.zeros((H1, H2), dtype).at[:h1, :h2].set(params["w2"].astype(dtype))
    b2p = jnp.zeros((1, H2), jnp.float32).at[:, :h2].set(params["b2"])

    whp = (jnp.zeros((H2, HEAD), dtype)
           .at[:h2, :a_dim].set(params["wm"].astype(dtype))
           .at[:h2, a_dim:2 * a_dim].set(params["ws"].astype(dtype)))
    bhp = (jnp.zeros((1, HEAD), jnp.float32)
           .at[:, :a_dim].set(params["bm"])
           .at[:, a_dim:2 * a_dim].set(params["bs"]))

    fmax = float(jnp.finfo(jnp.float32).max)
    lo = (jnp.full((1, HEAD), -fmax, jnp.float32)
          .at[:, a_dim:2 * a_dim].set(LOG_STD_MIN))
    hi = (jnp.full((1, HEAD), fmax, jnp.float32)
          .at[:, a_dim:2 * a_dim].set(LOG_STD_MAX))

    return dict(w1=w1p, b1=b1p, w2=w2p, b2=b2p, wh=whp, bh=bhp, lo=lo, hi=hi,
                action_dim=a_dim, compute_dtype=dtype)


def _choose_tiling(B, tile_b):
    """Pick (tile, padded_batch): tile multiple of 16 (bf16 sublane packing),
    capped at 8192 (v5e scoped-VMEM safety), and >= 2 grid tiles so both v7x
    TensorCores get work even for small batches."""
    tile_b = int(min(max(16, _round_up(tile_b, 16)), 8192))
    b16 = _round_up(max(B, 1), 16)
    if b16 <= tile_b:
        tile = max(16, _round_up(-(-b16 // 2), 16))   # split small batch in two
    else:
        tile = tile_b
    b_pad = _round_up(b16, tile)
    if b_pad // tile < 2:
        b_pad = 2 * tile
    return tile, b_pad


def gaussian_policy_forward(x, packed, *, tile_b=2048):
    """x: (B, input_dim) float32.  Returns (mean, log_std), each (B, A) f32."""
    B, in_dim = x.shape
    A = packed["action_dim"]
    cdt = packed["compute_dtype"]
    HEAD = packed["wh"].shape[1]

    tile, B_pad = _choose_tiling(B, tile_b)
    num_tiles = B_pad // tile

    x = x.astype(cdt)
    if B_pad != B:
        x = jnp.pad(x, ((0, B_pad - B), (0, 0)))

    w1, b1 = packed["w1"], packed["b1"]
    w2, b2 = packed["w2"], packed["b2"]
    wh, bh = packed["wh"], packed["bh"]
    lo, hi = packed["lo"], packed["hi"]

    def resident(a):  # same block every grid step -> stays VMEM-resident
        return pl.BlockSpec(a.shape, lambda i: (0,) * a.ndim)

    out_dtype = cdt   # bf16 output halves the padded writeback (f32 path stays f32)

    flops = 2 * B_pad * (in_dim * w1.shape[1]
                         + w1.shape[1] * w2.shape[1]
                         + w2.shape[1] * HEAD)
    bytes_accessed = (sum(int(a.size * a.dtype.itemsize)
                          for a in (x, w1, b1, w2, b2, wh, bh, lo, hi))
                      + B_pad * HEAD * jnp.dtype(out_dtype).itemsize)

    out = pl.pallas_call(
        _policy_kernel,
        out_shape=jax.ShapeDtypeStruct((B_pad, HEAD), out_dtype),
        grid=(num_tiles,),
        in_specs=[
            pl.BlockSpec((tile, in_dim), lambda i: (i, 0)),   # x streamed per tile
            resident(w1), resident(b1),
            resident(w2), resident(b2),
            resident(wh), resident(bh),
            resident(lo), resident(hi),
        ],
        out_specs=pl.BlockSpec((tile, HEAD), lambda i: (i, 0)),
        compiler_params=pltpu.CompilerParams(
            dimension_semantics=("parallel",)),               # both TCs on v7x
        cost_estimate=pl.CostEstimate(flops=flops, transcendentals=0,
                                      bytes_accessed=bytes_accessed),
    )(x, w1, b1, w2, b2, wh, bh, lo, hi)

    # One contiguous slice of the padded slab, then split mean / log_std.
    head_out = out[:B, :2 * A].astype(jnp.float32)
    return head_out[:, :A], head_out[:, A:]


def init_params(key, input_dim, hidden_dims, action_dim):
    """Deterministic init mimicking nn.Linear defaults: U(-1/sqrt(fan_in), +...)."""
    params = {}
    dims = [(input_dim, hidden_dims[0], "1"),
            (hidden_dims[0], hidden_dims[1], "2"),
            (hidden_dims[1], action_dim, "m"),
            (hidden_dims[1], action_dim, "s")]
    keys = jax.random.split(key, 2 * len(dims))
    for i, (fan_in, fan_out, tag) in enumerate(dims):
        bound = 1.0 / jnp.sqrt(jnp.float32(fan_in))
        # stored as (in, out) so kernel does x @ W  (== x @ W_pt.T)
        params["w" + tag] = jax.random.uniform(
            keys[2 * i], (fan_in, fan_out), jnp.float32, -bound, bound)
        params["b" + tag] = jax.random.uniform(
            keys[2 * i + 1], (1, fan_out), jnp.float32, -bound, bound)
    return params


def reference_forward(x, params):
    h = jnp.maximum(x @ params["w1"] + params["b1"], 0.0)
    h = jnp.maximum(h @ params["w2"] + params["b2"], 0.0)
    mean = h @ params["wm"] + params["bm"]
    log_std = jnp.clip(h @ params["ws"] + params["bs"], LOG_STD_MIN, LOG_STD_MAX)
    return mean, log_std


if __name__ == "__main__":
    # Small shapes consistent with the module: batch=2 states of dim 8,
    # hidden_dims=(32, 32), 4-dimensional continuous action space.
    B, INPUT_DIM, HIDDEN, ACTION_DIM = 2, 8, (32, 32), 4

    key = jax.random.PRNGKey(0)
    k_param, k_x = jax.random.split(key)
    params = init_params(k_param, INPUT_DIM, HIDDEN, ACTION_DIM)
    x = jax.random.normal(k_x, (B, INPUT_DIM), jnp.float32)

    ref_mean, ref_log_std = reference_forward(x, params)

    # 1) Default bf16-MXU path (production configuration).
    packed_bf16 = pack_params(params)                       # dtype=bf16 default
    mean, log_std = gaussian_policy_forward(x, packed_bf16)
    jax.block_until_ready((mean, log_std))
    assert mean.shape == (B, ACTION_DIM) and log_std.shape == (B, ACTION_DIM)
    assert jnp.allclose(mean, ref_mean, atol=5e-2)
    assert jnp.allclose(log_std, ref_log_std, atol=5e-2)
    assert bool(jnp.all(log_std >= LOG_STD_MIN)) and bool(jnp.all(log_std <= LOG_STD_MAX))

    # 2) f32 path for a tight numerical check against the pure-JAX reference.
    packed_f32 = pack_params(params, dtype=jnp.float32)
    mean32, log_std32 = gaussian_policy_forward(x, packed_f32)
    jax.block_until_ready((mean32, log_std32))
    assert jnp.allclose(mean32, ref_mean, atol=1e-5)
    assert jnp.allclose(log_std32, ref_log_std, atol=1e-5)

    print("KERNEL_OK")
</pallas_src>

<mosaic_0001>
module attributes {stable_mosaic.version = 11 : i64} {
  func.func @_policy_kernel(%arg0: i32, %arg1: memref<16x8xbf16, #tpu.memory_space<vmem>>, %arg2: memref<8x128xbf16, #tpu.memory_space<vmem>>, %arg3: memref<1x128xf32, #tpu.memory_space<vmem>>, %arg4: memref<128x128xbf16, #tpu.memory_space<vmem>>, %arg5: memref<1x128xf32, #tpu.memory_space<vmem>>, %arg6: memref<128x128xbf16, #tpu.memory_space<vmem>>, %arg7: memref<1x128xf32, #tpu.memory_space<vmem>>, %arg8: memref<1x128xf32, #tpu.memory_space<vmem>>, %arg9: memref<1x128xf32, #tpu.memory_space<vmem>>, %arg10: memref<16x128xbf16, #tpu.memory_space<vmem>>) attributes {dimension_semantics = [#tpu.dimension_semantics<parallel>], iteration_bounds = array<i64: 2>, scalar_prefetch = 0 : i64, scratch_operands = 0 : i64, tpu.core_type = #tpu.core_type<tc>, window_params = [{transform_indices = @transform_0, window_bounds = array<i64: 16, 8>}, {pipeline_mode = #tpu.pipeline_mode<synchronous>, transform_indices = @transform_1, window_bounds = array<i64: 8, 128>}, {pipeline_mode = #tpu.pipeline_mode<synchronous>, transform_indices = @transform_2, window_bounds = array<i64: 1, 128>}, {pipeline_mode = #tpu.pipeline_mode<synchronous>, transform_indices = @transform_3, window_bounds = array<i64: 128, 128>}, {pipeline_mode = #tpu.pipeline_mode<synchronous>, transform_indices = @transform_4, window_bounds = array<i64: 1, 128>}, {pipeline_mode = #tpu.pipeline_mode<synchronous>, transform_indices = @transform_5, window_bounds = array<i64: 128, 128>}, {pipeline_mode = #tpu.pipeline_mode<synchronous>, transform_indices = @transform_6, window_bounds = array<i64: 1, 128>}, {pipeline_mode = #tpu.pipeline_mode<synchronous>, transform_indices = @transform_7, window_bounds = array<i64: 1, 128>}, {pipeline_mode = #tpu.pipeline_mode<synchronous>, transform_indices = @transform_8, window_bounds = array<i64: 1, 128>}, {transform_indices = @transform_9, window_bounds = array<i64: 16, 128>}]} {
    %c0 = arith.constant 0 : index
    %c0_0 = arith.constant 0 : index
    %0 = vector.load %arg1[%c0, %c0_0] : memref<16x8xbf16, #tpu.memory_space<vmem>>, vector<16x8xbf16>
    %c0_1 = arith.constant 0 : index
    %c0_2 = arith.constant 0 : index
    %1 = vector.load %arg2[%c0_1, %c0_2] : memref<8x128xbf16, #tpu.memory_space<vmem>>, vector<8x128xbf16>
    %cst = arith.constant dense<0.000000e+00> : vector<16x128xf32>
    %2 = tpu.matmul %0, %1, %cst {dimension_numbers = #tpu.dot_dimension_numbers<[1], [0], [0], [1], [0, 0, 1, 1], [], []>} : vector<16x8xbf16>, vector<8x128xbf16>, vector<16x128xf32> -> vector<16x128xf32>
    %c0_3 = arith.constant 0 : index
    %c0_4 = arith.constant 0 : index
    %3 = vector.load %arg3[%c0_3, %c0_4] : memref<1x128xf32, #tpu.memory_space<vmem>>, vector<1x128xf32>
    %4 = vector.broadcast %3 : vector<1x128xf32> to vector<16x128xf32>
    %5 = arith.addf %2, %4 : vector<16x128xf32>
    %cst_5 = arith.constant 0.000000e+00 : f32
    %6 = vector.broadcast %cst_5 : f32 to vector<16x128xf32>
    %7 = arith.maximumf %5, %6 : vector<16x128xf32>
    %8 = arith.truncf %7 : vector<16x128xf32> to vector<16x128xbf16>
    %c0_6 = arith.constant 0 : index
    %c0_7 = arith.constant 0 : index
    %9 = vector.load %arg4[%c0_6, %c0_7] : memref<128x128xbf16, #tpu.memory_space<vmem>>, vector<128x128xbf16>
    %cst_8 = arith.constant dense<0.000000e+00> : vector<16x128xf32>
    %10 = tpu.matmul %8, %9, %cst_8 {dimension_numbers = #tpu.dot_dimension_numbers<[1], [0], [0], [1], [0, 0, 1, 1], [], []>} : vector<16x128xbf16>, vector<128x128xbf16>, vector<16x128xf32> -> vector<16x128xf32>
    %c0_9 = arith.constant 0 : index
    %c0_10 = arith.constant 0 : index
    %11 = vector.load %arg5[%c0_9, %c0_10] : memref<1x128xf32, #tpu.memory_space<vmem>>, vector<1x128xf32>
    %12 = vector.broadcast %11 : vector<1x128xf32> to vector<16x128xf32>
    %13 = arith.addf %10, %12 : vector<16x128xf32>
    %cst_11 = arith.constant 0.000000e+00 : f32
    %14 = vector.broadcast %cst_11 : f32 to vector<16x128xf32>
    %15 = arith.maximumf %13, %14 : vector<16x128xf32>
    %16 = arith.truncf %15 : vector<16x128xf32> to vector<16x128xbf16>
    %c0_12 = arith.constant 0 : index
    %c0_13 = arith.constant 0 : index
    %17 = vector.load %arg6[%c0_12, %c0_13] : memref<128x128xbf16, #tpu.memory_space<vmem>>, vector<128x128xbf16>
    %cst_14 = arith.constant dense<0.000000e+00> : vector<16x128xf32>
    %18 = tpu.matmul %16, %17, %cst_14 {dimension_numbers = #tpu.dot_dimension_numbers<[1], [0], [0], [1], [0, 0, 1, 1], [], []>} : vector<16x128xbf16>, vector<128x128xbf16>, vector<16x128xf32> -> vector<16x128xf32>
    %c0_15 = arith.constant 0 : index
    %c0_16 = arith.constant 0 : index
    %19 = vector.load %arg7[%c0_15, %c0_16] : memref<1x128xf32, #tpu.memory_space<vmem>>, vector<1x128xf32>
    %20 = vector.broadcast %19 : vector<1x128xf32> to vector<16x128xf32>
    %21 = arith.addf %18, %20 : vector<16x128xf32>
    %c0_17 = arith.constant 0 : index
    %c0_18 = arith.constant 0 : index
    %22 = vector.load %arg8[%c0_17, %c0_18] : memref<1x128xf32, #tpu.memory_space<vmem>>, vector<1x128xf32>
    %23 = vector.broadcast %22 : vector<1x128xf32> to vector<16x128xf32>
    %24 = arith.maximumf %21, %23 : vector<16x128xf32>
    %c0_19 = arith.constant 0 : index
    %c0_20 = arith.constant 0 : index
    %25 = vector.load %arg9[%c0_19, %c0_20] : memref<1x128xf32, #tpu.memory_space<vmem>>, vector<1x128xf32>
    %26 = vector.broadcast %25 : vector<1x128xf32> to vector<16x128xf32>
    %27 = arith.minimumf %24, %26 : vector<16x128xf32>
    %28 = arith.truncf %27 : vector<16x128xf32> to vector<16x128xbf16>
    %c0_21 = arith.constant 0 : index
    %c0_22 = arith.constant 0 : index
    %29 = vector.load %arg10[%c0_21, %c0_22] : memref<16x128xbf16, #tpu.memory_space<vmem>>, vector<16x128xbf16>
    tpu.vector_store %arg10[%c0_21, %c0_22], %28 {strides = array<i32>} : memref<16x128xbf16, #tpu.memory_space<vmem>>, vector<16x128xbf16>,
    return
  }
  func.func @transform_0(%arg0: i32) -> (i32, i32) {
    %c0_i32 = arith.constant 0 : i32
    %c0_i32_0 = arith.constant 0 : i32
    return %arg0, %c0_i32 : i32, i32
  }
  func.func @transform_1(%arg0: i32) -> (i32, i32) {
    %c0_i32 = arith.constant 0 : i32
    %c0_i32_0 = arith.constant 0 : i32
    %c0_i32_1 = arith.constant 0 : i32
    return %c0_i32, %c0_i32_0 : i32, i32
  }
  func.func @transform_2(%arg0: i32) -> (i32, i32) {
    %c0_i32 = arith.constant 0 : i32
    %c0_i32_0 = arith.constant 0 : i32
    %c0_i32_1 = arith.constant 0 : i32
    return %c0_i32, %c0_i32_0 : i32, i32
  }
  func.func @transform_3(%arg0: i32) -> (i32, i32) {
    %c0_i32 = arith.constant 0 : i32
    %c0_i32_0 = arith.constant 0 : i32
    %c0_i32_1 = arith.constant 0 : i32
    return %c0_i32, %c0_i32_0 : i32, i32
  }
  func.func @transform_4(%arg0: i32) -> (i32, i32) {
    %c0_i32 = arith.constant 0 : i32
    %c0_i32_0 = arith.constant 0 : i32
    %c0_i32_1 = arith.constant 0 : i32
    return %c0_i32, %c0_i32_0 : i32, i32
  }
  func.func @transform_5(%arg0: i32) -> (i32, i32) {
    %c0_i32 = arith.constant 0 : i32
    %c0_i32_0 = arith.constant 0 : i32
    %c0_i32_1 = arith.constant 0 : i32
    return %c0_i32, %c0_i32_0 : i32, i32
  }
  func.func @transform_6(%arg0: i32) -> (i32, i32) {
    %c0_i32 = arith.constant 0 : i32
    %c0_i32_0 = arith.constant 0 : i32
    %c0_i32_1 = arith.constant 0 : i32
    return %c0_i32, %c0_i32_0 : i32, i32
  }
  func.func @transform_7(%arg0: i32) -> (i32, i32) {
    %c0_i32 = arith.constant 0 : i32
    %c0_i32_0 = arith.constant 0 : i32
    %c0_i32_1 = arith.constant 0 : i32
    return %c0_i32, %c0_i32_0 : i32, i32
  }
  func.func @transform_8(%arg0: i32) -> (i32, i32) {
    %c0_i32 = arith.constant 0 : i32
    %c0_i32_0 = arith.constant 0 : i32
    %c0_i32_1 = arith.constant 0 : i32
    return %c0_i32, %c0_i32_0 : i32, i32
  }
  func.func @transform_9(%arg0: i32) -> (i32, i32) {
    %c0_i32 = arith.constant 0 : i32
    %c0_i32_0 = arith.constant 0 : i32
    return %arg0, %c0_i32 : i32, i32
  }
}

</mosaic_0001>

<bundles_post_ra>
// kernel: tpu_custom_call.1
= control target key start
LH: loop header
LB: loop body
LE: loop exit
PB: predicated region body
PF: predicated region fallthrough
CT: control target
= control target key end

     0   :  { %s1181_s0 = inlined_call_operand.vmem [shape: bf16[32,8], index: 0, kind: input, shape index: {}]   ;;  %s1182_s1 = inlined_call_operand.vmem [shape: bf16[8,128], index: 1, kind: input, shape index: {}]   ;;  %s1183_s2 = inlined_call_operand.vmem [shape: f32[1,128], index: 2, kind: input, shape index: {}]   ;;  %s1184_s3 = inlined_call_operand.hbm [shape: bf16[128,128], index: 3, kind: input, shape index: {}]   ;;  %s1185_s4 = inlined_call_operand.vmem [shape: f32[1,128], index: 4, kind: input, shape index: {}]   ;;  %s1186_s5 = inlined_call_operand.hbm [shape: bf16[128,128], index: 5, kind: input, shape index: {}]   ;;  %s1187_s6 = inlined_call_operand.vmem [shape: f32[1,128], index: 6, kind: input, shape index: {}]   ;;  %s1188_s7 = inlined_call_operand.vmem [shape: f32[1,128], index: 7, kind: input, shape index: {}]   ;;  %s1189_s8 = inlined_call_operand.vmem [shape: f32[1,128], index: 8, kind: input, shape index: {}]   ;;  %s1190_s9 = inlined_call_operand.hbm [shape: bf16[32,128], index: 9, kind: output, shape index: {}]  }
   0x1   :  { %1191 = sst [smem:[#allocation11_spill]] %s1181_s0 }
   0x2   :  { %14 = vsyncpa [#allocation3], 0 }
   0x3   :  { %15 = vsyncpa [#allocation6], 0 }
   0x4   :  { %16 = vsyncpa [#allocation4], 0 }
   0x5   :  { %18 = vsyncpa [#allocation4 + $0x1], 0  ;;  %s1054_s30 = smov 0   ;;  %s1056_s10 = smov 0  }
   0x6   :  { %s1058_s11 = smov 0   ;;  %s1060_s12 = smov 0  }
   0x7 LB: > { %s1075_s13 = sadd.s32 4294967295, %s996_s12   ;;  %s689_s14 = sadd.s32 4294967294, %s996_s12   ;;  %s996_s12 = sphi %s1060_s12, %s1199_s12   ;;  %s992_s11 = sphi %s1058_s11, %s1198_s11   ;;  %s988_s10 = sphi %s1056_s10, %s1197_s10   ;;  %s984_s30 = sphi %s1054_s30, %s1196_s30  }
   0x8   : > { %s1079_s15 = sadd.s32 1, %s996_s12   ;;  %s225_s16 = sadd.s32 1, %s992_s11 }
   0x9   : > { %s222_s17 = ssub.s32 %s996_s12, %s1079_s15  ;;  %p235_p0 = scmp.ne.s32.totalorder %s992_s11, %s988_s10 }
   0xa   : > { %p223_p1 = scmp.eq.s32.totalorder %s222_s17, 0  ;;  %p236_p2 = scmp.eq.s32.totalorder %s1075_s13, 1 }
   0xb   : > { %p241_p3 = scmp.ne.s32.totalorder %s988_s10, %s984_s30  ;;  %p242_p4 = scmp.eq.s32.totalorder %s689_s14, 1 }
   0xc   : > { %s1090_s18 = scalar_select %p223_p1, %s992_s11, %s225_s16  }
   0xd   : > { %p1092_p5 = por %p236_p2, %p235_p0  ;;  %p1096_p6 = por %p242_p4, %p241_p3 }
   0xe   : > { %p690_p7 = scmp.ge.s32.totalorder %s996_s12, 1  ;;  %p249_p8 = scmp.lt.s32.totalorder %s996_s12, 3 }
   0xf   : > { %p818_p9 = scmp.eq.s32.totalorder %s1075_s13, 0  ;;  %s266_s24 = sshll.u32 %s1184_s3, 4  ;;  %s267_s24 = int_to_ptr.hbm [resolvable:$true] %s266_s24 }
  0x10   : > { %p1103_p10 = pnand %p690_p7, %p249_p8  ;;  %s998_s25 = smov [#allocation2]  }
  0x11   : > { %s268_s26 = sshll.u32 %s998_s25, 4  ;;  %s283_s29 = sshll.u32 %s1186_s5, 4  ;;  %s269_s26 = int_to_ptr.vmem [resolvable:$true] %s268_s26  ;;  %s284_s29 = int_to_ptr.hbm [resolvable:$true] %s283_s29 }
  0x12   : > { %p807_p11 = pneg %p1103_p10  ;;  %s999_s14 = smov 64  }
  0x13   : > { %s1000_s16 = smov 4   ;;  %s1001_s17 = smov [#allocation5]  }
  0x14   : > { %p808_p12 = pnand %p818_p9, %p807_p11  ;;  %s285_s22 = sshll.u32 %s1001_s17, 4  ;;  %s286_s22 = int_to_ptr.vmem [resolvable:$true] %s285_s22 }
  0x15   : > { %319 = sbr.rel (%p1103_p10) target bundleno = 469 (0x1d5), region = 56 }
  0x16   : > { %810 = dma.hbm_to_vmem [thread:$0]  (!%p808_p12), %s267_s24, 1024, %s269_s26, [#allocation3], %s999_s14, %s999_s14, %s1000_s16  }
  0x17   : > { %813 = dma.hbm_to_vmem [thread:$0]  (!%p808_p12), %s284_s29, 1024, %s286_s22, [#allocation6], %s999_s14, %s999_s14, %s1000_s16  }
  0x1a   : > { %971 = dma.done.wait (%p818_p9), [#allocation3], 1024  }
  0x1b   : > { %973 = vsyncadd (%p818_p9), [#allocation3], 4294966272 }
  0x1c   : > { %975 = dma.done.wait (%p818_p9), [#allocation6], 1024  }
  0x1d   : > { %977 = vsyncadd (%p818_p9), [#allocation6], 4294966272  ;;  %s698_s23 = sshll.u32 %s1075_s13, 1  ;;  %vm385_vm0 = vcmask 1043456   ;;  %s1195_s0 = sld [smem:[#allocation11_spill]]  ;;  %v782_v1 = vld [vmem:[#allocation2 + $0x38] sm:$0xff] }
  0x1e   : > { %p362_p13 = scmp.lt.s32.totalorder %s698_s23, 3  ;;  %v371_v0 = vld [vmem:[%s1182_s1] sm:$0xf]  ;;  %vm381_vm1 = vcmask 64512   ;;  %474 = vmatpush.bf16.msra.mxu1 %v782_v1  ;;  %v781_v4 = vld [vmem:[#allocation2 + $0x30] sm:$0xff]  ;;  %v780_v5 = vld [vmem:[#allocation2 + $0x28] sm:$0xff] }
  0x1f   : > { %v387_v2 = vsel %vm385_vm0, %v371_v0, 0  ;;  %v779_v6 = vld [vmem:[#allocation2 + $0x20] sm:$0xff]  ;;  %v778_v7 = vld [vmem:[#allocation2 + $0x18] sm:$0xff]  ;;  %v777_v8 = vld [vmem:[#allocation2 + $0x10] sm:$0xff]  ;;  %s791_s27 = sshll.u32 %s1075_s13, 3 }
  0x20   : > { %s1201_s23 = smov (!%p362_p13, %s698_s23), 3  ;;  %396 = vmatpush.bf16.msra.mxu0 %v387_v2  ;;  %v776_v9 = vld [vmem:[#allocation2 + $0x8] sm:$0xff]  ;;  %v775_v10 = vld [vmem:[#allocation2] sm:$0xff]  ;;  %v790_v11 = vld [vmem:[#allocation5 + $0x38] sm:$0xff]  ;;  %s601_s14 = scalar_lea.hbm %s1190_s9, %s791_s27 }
  0x21   : > { %s699_s24 = sshll.u32 %s1201_s23, 2  ;;  %559 = vmatpush.bf16.msra.mxu2 %v790_v11  ;;  %v789_v12 = vld [vmem:[#allocation5 + $0x30] sm:$0xff]  ;;  %v788_v13 = vld [vmem:[#allocation5 + $0x28] sm:$0xff]  ;;  %v787_v14 = vld [vmem:[#allocation5 + $0x20] sm:$0xff] }
  0x22   : > { %475 = vmatpush.bf16.msra.mxu1 %v781_v4  ;;  %v861_v16 = vld [vmem:[%s1183_s2] ss:$0 sm:$0xff]  ;;  %v786_v23 = vld [vmem:[#allocation5 + $0x18] sm:$0xff]  ;;  %v785_v24 = vld [vmem:[#allocation5 + $0x10] sm:$0xff] }
  0x23   : > { %s365_s26 = scalar_lea.vmem %s1195_s0, %s699_s24  ;;  %v784_v25 = vld [vmem:[#allocation5 + $0x8] sm:$0xff]  ;;  %v783_v26 = vld [vmem:[#allocation5] sm:$0xff]  ;;  %s358_s24 = sand.u32 1, %s988_s10  }
  0x24   : > { %v774_v3 = vld [vmem:[%s365_s26] sm:$0xff]  ;;  %s697_s26 = sshll.u32 %s358_s24, 3  ;;  %s604_s0 = sshll.u32 %s601_s14, 4  ;;  %s605_s0 = int_to_ptr.hbm [resolvable:$true] %s604_s0 }
  0x25   : > { %704 = vmatmul.msk.bf16.vlgmr.msra.gmra.mxu0 %vm381_vm1, %v774_v3  ;;  %560 = vmatpush.bf16.msra.mxu2 %v789_v12  ;;  %v862_v28 = vld [vmem:[%s1185_s4] ss:$0 sm:$0xff]  ;;  %s360_s22 = scalar_lea.vmem [#allocation7], %s697_s26  ;;  %s590_s13 = scalar_lea.sflag [#allocation4], %s358_s24 }
  0x26   : > { %476 = vmatpush.bf16.msra.mxu1 %v780_v5  ;;  %v863_v36 = vld [vmem:[%s1187_s6] ss:$0 sm:$0xff]  ;;  %s602_s23 = sshll.u32 %s360_s22, 4  ;;  %s940_s21 = sshra.s32 %s605_s0, 4  ;;  %s603_s23 = int_to_ptr.vmem [resolvable:$true] %s602_s23  ;;  %s941_s21 = int_to_ptr.hbm [resolvable:$true] %s940_s21 }
  0x27   : > { %v864_v38 = vld [vmem:[%s1188_s7] ss:$0 sm:$0xff]  ;;  %s942_s25 = scalar_lea.hbm %s941_s21, 8  ;;  %s946_s26 = scalar_lea.hbm %s1190_s9, 16 }
  0x28   : > { %v865_v41 = vld [vmem:[%s1189_s8] ss:$0 sm:$0xff]  ;;  %p943_p0 = scmp.ne.s32.totalorder %s941_s21, %s942_s25  ;;  %p947_p3 = scmp.lt.s32.totalorder %s941_s21, %s1190_s9 }
  0x29   : > { %561 = vmatpush.bf16.msra.mxu2 %v788_v13  ;;  %p948_p4 = scmp.lt.s32.totalorder %s946_s26, %s942_s25 }
  0x2a   : > { %477 = vmatpush.bf16.msra.mxu1 %v779_v6  ;;  %p944_p1 = pnand %p943_p0, %p1092_p5 }
  0x2b   : > { %p949_p7 = por %p948_p4, %p947_p3 }
  0x2c   : > { %p945_p2 = pneg %p944_p1 }
  0x2d   : > { %562 = vmatpush.bf16.msra.mxu2 %v787_v14 }
  0x2e   : > { %478 = vmatpush.bf16.msra.mxu1 %v778_v7  ;;  %p950_p8 = pnand %p949_p7, %p945_p2 }
  0x31   : > { %563 = vmatpush.bf16.msra.mxu2 %v786_v23 }
  0x32   : > { %479 = vmatpush.bf16.msra.mxu1 %v777_v8 }
  0x35   : > { %564 = vmatpush.bf16.msra.mxu2 %v785_v24 }
  0x36   : > { %480 = vmatpush.bf16.msra.mxu1 %v776_v9 }
  0x39   : > { %565 = vmatpush.bf16.msra.mxu2 %v784_v25 }
  0x3a   : > { %481 = vmatpush.bf16.msra.mxu1 %v775_v10 }
  0x3d   : > { %566 = vmatpush.bf16.msra.mxu2 %v783_v26 }
  0xa2   : > { %v398_v15 = vpop.f32.mrf.mxu0 }
  0xa3   : > { %v399_v17 = vadd.f32 %v861_v16, %v398_v15 }
  0xa5   : > { %v403_v20 = vmax.f32 %v399_v17, 0.0 }
  0xaa   : > { %v400_v18 = vpop.f32.mrf.mxu0 }
  0xab   : > { %v401_v19 = vadd.f32 %v861_v16, %v400_v18 }
  0xad   : > { %v404_v21 = vmax.f32 %v401_v19, 0.0 }
  0xaf   : > { %v405_v22 = vpack.c.bf16 %v404_v21, %v403_v20 }
  0xb1   : > { %482 = vmatmul.bf16.vlgmr.msra.gmra.mxu1 %v405_v22 }
 0x12e   : > { %v483_v27 = vpop.f32.mrf.mxu1 }
 0x12f   : > { %v484_v29 = vadd.f32 %v862_v28, %v483_v27 }
 0x131   : > { %v488_v32 = vmax.f32 %v484_v29, 0.0 }
 0x136   : > { %v485_v30 = vpop.f32.mrf.mxu1 }
 0x137   : > { %v486_v31 = vadd.f32 %v862_v28, %v485_v30 }
 0x139   : > { %v489_v33 = vmax.f32 %v486_v31, 0.0 }
 0x13b   : > { %v490_v34 = vpack.c.bf16 %v489_v33, %v488_v32 }
 0x13d   : > { %567 = vmatmul.bf16.vlgmr.msra.gmra.mxu2 %v490_v34 }
 0x1c0   : > { %v568_v35 = vpop.f32.mrf.mxu2 }
 0x1c1   : > { %v569_v37 = vadd.f32 %v863_v36, %v568_v35 }
 0x1c3   : > { %v577_v40 = vmax.f32 %v569_v37, %v864_v38 }
 0x1c5   : > { %v583_v44 = vmin.f32 %v577_v40, %v865_v41 }
 0x1c8   : > { %v570_v39 = vpop.f32.mrf.mxu2 }
 0x1c9   : > { %v571_v42 = vadd.f32 %v863_v36, %v570_v39 }
 0x1cb   : > { %v578_v43 = vmax.f32 %v571_v42, %v864_v38 }
 0x1cd   : > { %v584_v45 = vmin.f32 %v578_v43, %v865_v41 }
 0x1cf   : > { %v795_v46 = vpack.c.bf16 %v584_v45, %v583_v44 }
 0x1d1   : > { %796 = vst [vmem:[%s360_s22] sm:$0xff] %v795_v46  }
 0x1d2   : > { %953 = shalt.err (!%p950_p8)
}
 0x1d3   : > { %s1002_s24 = smov 64   ;;  %s1003_s16 = smov 4  }
 0x1d4   : > { %805 = dma.vmem_to_hbm [thread:$0]  (%p1092_p5), %s603_s23, 128, %s605_s0, %s590_s13, %s1002_s24, %s1002_s24, %s1003_s16  }
 0x1d5 PF: > { %p822_p9 = scmp.ge.s32.totalorder %s996_s12, 2  ;;  %s619_s17 = sand.u32 1, %s984_s30  }
 0x1d6   : > { %s620_s22 = scalar_lea.sflag [#allocation4], %s619_s17 }
 0x1d7   : > { %p815_p10 = pnand %p822_p9, %p1096_p6 }
 0x1d9   : > { %p816_p11 = pneg %p815_p10 }
 0x1db   : > { %979 = dma.done.wait (%p816_p11), %s620_s22, 128  }
 0x1dc   : > { %981 = vsyncadd (%p816_p11), %s620_s22, 4294967168  ;;  %p21_p12 = scmp.ge.s32.totalorder %s1079_s15, 4   ;;  %s1196_s30 = smov %s988_s10 }
 0x1dd   : > { %s1197_s10 = smov %s992_s11  ;;  %s1198_s11 = smov %s1090_s18 }
 0x1de   : > { %s1199_s12 = smov %s1079_s15  ;;  %23 = sbr.rel (!%p21_p12) target bundleno = 7 (0x7), region = 100 }
 0x1e3   :  { %626 = vsyncpa [#allocation3], 1 }
 0x1e4   :  { %628 = vsyncpa [#allocation3 + $0x1], 1 }
 0x1e5   :  { %629 = vsyncpa [#allocation6], 1 }
 0x1e6   :  { %630 = vsyncpa [#allocation4], 1 }
 0x1e7   :  { %632 = vsyncpa [#allocation4 + $0x1], 1 }

</bundles_post_ra>
